<compile_context>
chip_gen: v6e
topology: v6e:2x2x1
jax: 0.10.0
libtpu: 0.0.40
codegen_flags: <defaults>
</compile_context>

<pallas_src>
import functools

import jax
import jax.numpy as jnp
from jax.experimental import pallas as pl
from jax.experimental.pallas import tpu as pltpu


def _round_up(x, m):
    return (x + m - 1) // m * m


def _cdiv(a, b):
    return (a + b - 1) // b


def _phase_offsets_1d(k, s, p, d):
    """Sub-pixel decomposition of a 1-D transposed conv.

    Returns (taps, offs):
      taps[r] = [(t, e), ...]: kernel tap t contributes to output phase r
                               reading input index q + e   (output o = q*s + r)
      offs    = sorted set of all offsets e (shared patch footprint per axis).
    """
    lo = d * (k - 1) - p
    taps = []
    for r in range(s):
        lst = []
        for t in range(k):
            num = r + t * d - lo
            if num % s == 0:
                lst.append((t, num // s))
        taps.append(lst)
    offs = sorted({e for lst in taps for (_, e) in lst})
    return taps, offs


def _gated_matmul_kernel(p_ref, w_ref, b_ref, o_ref, *, n_branch, activation):
    # p_ref: (tm, K_pad)   w_ref: (K_pad, 2*n_branch)   b_ref: (1, 2*n_branch)
    # o_ref: (tm, n_branch)
    y = jnp.dot(p_ref[...], w_ref[...], preferred_element_type=jnp.float32)
    y = y + b_ref[...]                     # single bias add on fused result
    h = y[:, :n_branch]                    # "h" branch columns (all phases)
    g = y[:, n_branch:]                    # "g" gate columns (all phases)
    if activation is not None:
        h = activation(h)
    o_ref[...] = (h * jax.nn.sigmoid(g)).astype(o_ref.dtype)


def gated_conv_transpose2d(x, wh, bh, wg, bg, *, stride, padding,
                           output_padding=0, dilation=1, activation=None,
                           tm=1024, compute_dtype=jnp.bfloat16, out_dtype=None):
    """Gated ConvTranspose2d forward.

    x      : [B, C_in, H, W]            (NCHW, like PyTorch)
    wh, wg : [C_in, C_out, kH, kW]      (PyTorch ConvTranspose2d weight layout)
    bh, bg : [C_out]
    returns: [B, C_out, H_out, W_out]   (NCHW)
    """
    B, C_in, H, W = x.shape
    C_in_w, C_out, kH, kW = wh.shape
    assert C_in == C_in_w and wg.shape == wh.shape
    s, p, d, op = stride, padding, dilation, output_padding
    out_dtype = x.dtype if out_dtype is None else out_dtype
    cdt = x.dtype if compute_dtype is None else compute_dtype

    H_out = (H - 1) * s - 2 * p + d * (kH - 1) + op + 1
    W_out = (W - 1) * s - 2 * p + d * (kW - 1) + op + 1

    taps_h, offs_h = _phase_offsets_1d(kH, s, p, d)
    taps_w, offs_w = _phase_offsets_1d(kW, s, p, d)
    KE_h, KE_w = len(offs_h), len(offs_w)
    Q_h, Q_w = _cdiv(H_out, s), _cdiv(W_out, s)

    # ---- wrapper-side layout plumbing: pad + phase-aware im2col -------------
    pad_lo_h = max(0, -offs_h[0])
    pad_hi_h = max(0, (Q_h - 1) + offs_h[-1] - (H - 1))
    pad_lo_w = max(0, -offs_w[0])
    pad_hi_w = max(0, (Q_w - 1) + offs_w[-1] - (W - 1))
    x_nhwc = jnp.transpose(x, (0, 2, 3, 1))
    xp = jnp.pad(x_nhwc, ((0, 0), (pad_lo_h, pad_hi_h),
                          (pad_lo_w, pad_hi_w), (0, 0)))
    cols = []
    for ey in offs_h:
        for ex in offs_w:
            sy, sx = ey + pad_lo_h, ex + pad_lo_w
            cols.append(xp[:, sy:sy + Q_h, sx:sx + Q_w, :])
    patches = jnp.stack(cols, axis=3)      # [B, Qh, Qw, KE_h*KE_w, C_in]
    M = B * Q_h * Q_w
    K = KE_h * KE_w * C_in
    patches = patches.reshape(M, K)

    # ---- per-phase weights packed as extra output columns --------------------
    N_out = s * s * C_out                  # real columns per branch (no pad)

    def to_phase_mat(w):                   # [C_in,C_out,kH,kW] -> [K, N_out]
        phase_cols = []
        for rh in range(s):
            for rw in range(s):
                wp = jnp.zeros((KE_h, KE_w, C_in, C_out), w.dtype)
                for (ty, ey) in taps_h[rh]:
                    for (tx, ex) in taps_w[rw]:
                        wp = wp.at[offs_h.index(ey), offs_w.index(ex)].set(
                            w[:, :, kH - 1 - ty, kW - 1 - tx])
                phase_cols.append(wp.reshape(K, C_out))
        return jnp.concatenate(phase_cols, axis=1)

    w_cat = jnp.concatenate([to_phase_mat(wh), to_phase_mat(wg)], axis=1)
    b_cat = jnp.concatenate([jnp.tile(bh, s * s), jnp.tile(bg, s * s)])
    b_cat = b_cat.astype(jnp.float32).reshape(1, 2 * N_out)

    # ---- pad/cast for TPU tiles; pick tm within an explicit VMEM budget -----
    in_bytes = jnp.dtype(cdt).itemsize
    ob = jnp.dtype(out_dtype).itemsize
    sub = {1: 32, 2: 16}.get(in_bytes, 8)  # packed-dtype sublane tile
    K_pad = _round_up(K, sub)

    w_cat = jnp.pad(w_cat, ((0, K_pad - K), (0, 0))).astype(cdt)

    weight_bytes = K_pad * 2 * N_out * in_bytes + 2 * N_out * 4

    def footprint(t):                      # double-buffered in/out + weights
        return weight_bytes + 2 * t * K_pad * in_bytes + 2 * t * N_out * ob

    budget = 28 << 20                      # safe under v7x 32 MiB scoped VMEM
    tm = max(sub, min(_round_up(tm, sub), _round_up(M, sub)))
    while footprint(tm) > budget and tm > sub:
        tm = max(sub, _round_up(tm // 2, sub))
    while _cdiv(M, tm) < 2 and tm > 256:   # >=2 steps for v7x's 2 TensorCores
        tm = _round_up(tm // 2, sub)
    M_pad = _round_up(M, tm)

    patches = jnp.pad(patches, ((0, M_pad - M), (0, K_pad - K))).astype(cdt)

    vmem_limit = min(max(int(footprint(tm)) + (8 << 20), 16 << 20), 64 << 20)

    kernel = functools.partial(_gated_matmul_kernel, n_branch=N_out,
                               activation=activation)
    out2d = pl.pallas_call(
        kernel,
        out_shape=jax.ShapeDtypeStruct((M_pad, N_out), out_dtype),
        grid_spec=pltpu.PrefetchScalarGridSpec(
            num_scalar_prefetch=0,
            grid=(M_pad // tm,),
            in_specs=[
                pl.BlockSpec((tm, K_pad), lambda i: (i, 0)),          # patches
                pl.BlockSpec((K_pad, 2 * N_out), lambda i: (0, 0)),   # fused W (resident)
                pl.BlockSpec((1, 2 * N_out), lambda i: (0, 0)),       # fused bias
            ],
            out_specs=pl.BlockSpec((tm, N_out), lambda i: (i, 0)),
        ),
        compiler_params=pltpu.CompilerParams(
            dimension_semantics=("parallel",),
            vmem_limit_bytes=vmem_limit),
    )(patches, w_cat, b_cat)

    # ---- pixel-shuffle the phases back into the spatial grid ----------------
    out = out2d[:M].reshape(B, Q_h, Q_w, s, s, C_out)
    out = jnp.transpose(out, (0, 1, 3, 2, 4, 5))
    out = out.reshape(B, Q_h * s, Q_w * s, C_out)[:, :H_out, :W_out, :]
    return jnp.transpose(out, (0, 3, 1, 2))    # back to NCHW


if __name__ == "__main__":
    # Small shapes consistent with the module:
    #   x: [2, 4, 16, 16], ConvTranspose2d(4 -> 8, k=3, stride=2, pad=1, out_pad=1)
    B, C_in, C_out, H, W = 2, 4, 8, 16, 16
    kH = kW = 3
    stride, padding, output_padding, dilation = 2, 1, 1, 1

    key = jax.random.PRNGKey(0)
    kx, kwh, kbh, kwg, kbg = jax.random.split(key, 5)
    x = jax.random.normal(kx, (B, C_in, H, W), dtype=jnp.float32)
    bound = 1.0 / jnp.sqrt(jnp.float32(C_in * kH * kW))
    wh = jax.random.uniform(kwh, (C_in, C_out, kH, kW), jnp.float32, -bound, bound)
    bh = jax.random.uniform(kbh, (C_out,), jnp.float32, -bound, bound)
    wg = jax.random.uniform(kwg, (C_in, C_out, kH, kW), jnp.float32, -bound, bound)
    bg = jax.random.uniform(kbg, (C_out,), jnp.float32, -bound, bound)

    out = gated_conv_transpose2d(
        x, wh, bh, wg, bg, stride=stride, padding=padding,
        output_padding=output_padding, dilation=dilation,
        activation=None)                      # module default: activation=None
    out = jax.block_until_ready(out)

    # Independent f32 reference: direct scatter-add transposed convolution.
    def conv_transpose2d_ref(xx, w, b):
        Bx, Ci, Hx, Wx = xx.shape
        _, Co, kh, kw = w.shape
        s, p, d, op = stride, padding, dilation, output_padding
        Ho = (Hx - 1) * s - 2 * p + d * (kh - 1) + op + 1
        Wo = (Wx - 1) * s - 2 * p + d * (kw - 1) + op + 1
        Hf = (Hx - 1) * s + d * (kh - 1) + 1 + op
        Wf = (Wx - 1) * s + d * (kw - 1) + 1 + op
        full = jnp.zeros((Bx, Co, Hf, Wf), jnp.float32)
        for ky in range(kh):
            for kx in range(kw):
                contrib = jnp.einsum('bihw,io->bohw', xx, w[:, :, ky, kx])
                full = full.at[:, :,
                               ky * d: ky * d + (Hx - 1) * s + 1: s,
                               kx * d: kx * d + (Wx - 1) * s + 1: s].add(contrib)
        return full[:, :, p:p + Ho, p:p + Wo] + b.reshape(1, -1, 1, 1)

    ref_h = conv_transpose2d_ref(x, wh, bh)
    ref_g = jax.nn.sigmoid(conv_transpose2d_ref(x, wg, bg))
    ref = ref_h * ref_g

    H_out = (H - 1) * stride - 2 * padding + dilation * (kH - 1) + output_padding + 1
    assert out.shape == (B, C_out, H_out, H_out), out.shape
    # 2e-2 tolerance: patches/weights are cast to bf16 (f32 accumulation),
    # vs the pure-f32 reference.
    assert jnp.allclose(out, ref, atol=2e-2, rtol=2e-2), \
        float(jnp.max(jnp.abs(out - ref)))
    print("KERNEL_OK")
</pallas_src>

<mosaic_0001>
module attributes {stable_mosaic.version = 11 : i64} {
  func.func @_gated_matmul_kernel(%arg0: i32, %arg1: memref<256x16xbf16, #tpu.memory_space<vmem>>, %arg2: memref<16x64xbf16, #tpu.memory_space<vmem>>, %arg3: memref<1x64xf32, #tpu.memory_space<vmem>>, %arg4: memref<256x32xf32, #tpu.memory_space<vmem>>) attributes {dimension_semantics = [#tpu.dimension_semantics<parallel>], iteration_bounds = array<i64: 2>, scalar_prefetch = 0 : i64, scratch_operands = 0 : i64, tpu.core_type = #tpu.core_type<tc>, window_params = [{transform_indices = @transform_0, window_bounds = array<i64: 256, 16>}, {pipeline_mode = #tpu.pipeline_mode<synchronous>, transform_indices = @transform_1, window_bounds = array<i64: 16, 64>}, {pipeline_mode = #tpu.pipeline_mode<synchronous>, transform_indices = @transform_2, window_bounds = array<i64: 1, 64>}, {transform_indices = @transform_3, window_bounds = array<i64: 256, 32>}]} {
    %c0 = arith.constant 0 : index
    %c0_0 = arith.constant 0 : index
    %0 = vector.load %arg1[%c0, %c0_0] : memref<256x16xbf16, #tpu.memory_space<vmem>>, vector<256x16xbf16>
    %c0_1 = arith.constant 0 : index
    %c0_2 = arith.constant 0 : index
    %1 = vector.load %arg2[%c0_1, %c0_2] : memref<16x64xbf16, #tpu.memory_space<vmem>>, vector<16x64xbf16>
    %cst = arith.constant dense<0.000000e+00> : vector<256x64xf32>
    %2 = tpu.matmul %0, %1, %cst {dimension_numbers = #tpu.dot_dimension_numbers<[1], [0], [0], [1], [0, 0, 1, 1], [], []>} : vector<256x16xbf16>, vector<16x64xbf16>, vector<256x64xf32> -> vector<256x64xf32>
    %c0_3 = arith.constant 0 : index
    %c0_4 = arith.constant 0 : index
    %3 = vector.load %arg3[%c0_3, %c0_4] : memref<1x64xf32, #tpu.memory_space<vmem>>, vector<1x64xf32>
    %4 = vector.broadcast %3 : vector<1x64xf32> to vector<256x64xf32>
    %5 = arith.addf %2, %4 : vector<256x64xf32>
    %6 = vector.extract_strided_slice %5 {offsets = [0, 0], sizes = [256, 32], strides = [1, 1]} : vector<256x64xf32> to vector<256x32xf32>
    %7 = vector.extract_strided_slice %5 {offsets = [0, 32], sizes = [256, 32], strides = [1, 1]} : vector<256x64xf32> to vector<256x32xf32>
    %8 = arith.negf %7 : vector<256x32xf32>
    %9 = math.exp %8 : vector<256x32xf32>
    %cst_5 = arith.constant 1.000000e+00 : f32
    %10 = vector.broadcast %cst_5 : f32 to vector<256x32xf32>
    %11 = arith.addf %10, %9 : vector<256x32xf32>
    %12 = arith.divf %10, %11 : vector<256x32xf32>
    %13 = arith.mulf %6, %12 : vector<256x32xf32>
    %c0_6 = arith.constant 0 : index
    %c0_7 = arith.constant 0 : index
    %14 = vector.load %arg4[%c0_6, %c0_7] : memref<256x32xf32, #tpu.memory_space<vmem>>, vector<256x32xf32>
    tpu.vector_store %arg4[%c0_6, %c0_7], %13 {strides = array<i32>} : memref<256x32xf32, #tpu.memory_space<vmem>>, vector<256x32xf32>,
    return
  }
  func.func @transform_0(%arg0: i32) -> (i32, i32) {
    %c0_i32 = arith.constant 0 : i32
    %c0_i32_0 = arith.constant 0 : i32
    return %arg0, %c0_i32 : i32, i32
  }
  func.func @transform_1(%arg0: i32) -> (i32, i32) {
    %c0_i32 = arith.constant 0 : i32
    %c0_i32_0 = arith.constant 0 : i32
    %c0_i32_1 = arith.constant 0 : i32
    return %c0_i32, %c0_i32_0 : i32, i32
  }
  func.func @transform_2(%arg0: i32) -> (i32, i32) {
    %c0_i32 = arith.constant 0 : i32
    %c0_i32_0 = arith.constant 0 : i32
    %c0_i32_1 = arith.constant 0 : i32
    return %c0_i32, %c0_i32_0 : i32, i32
  }
  func.func @transform_3(%arg0: i32) -> (i32, i32) {
    %c0_i32 = arith.constant 0 : i32
    %c0_i32_0 = arith.constant 0 : i32
    return %arg0, %c0_i32 : i32, i32
  }
}

</mosaic_0001>

<bundles_post_ra>
// kernel: tpu_custom_call.1
= control target key start
LH: loop header
LB: loop body
LE: loop exit
PB: predicated region body
PF: predicated region fallthrough
CT: control target
= control target key end

     0   :  { %s1266_s12 = smov 0   ;;  %s1590_s0 = inlined_call_operand.vmem [shape: bf16[512,16], index: 0, kind: input, shape index: {}]   ;;  %s1591_s1 = inlined_call_operand.vmem [shape: bf16[16,64], index: 1, kind: input, shape index: {}]   ;;  %s1592_s2 = inlined_call_operand.vmem [shape: f32[1,64], index: 2, kind: input, shape index: {}]   ;;  %s1593_s3 = inlined_call_operand.vmem [shape: f32[512,32], index: 3, kind: output, shape index: {}]  }
   0x1 LB: > { %s953_s13 = sadd.s32 4294967295, %s1243_s12   ;;  %p957_p0 = scmp.ge.s32.totalorder %s1243_s12, 1  ;;  %s1243_s12 = sphi %s1266_s12, %s13_s12  }
   0x2   : > { %p138_p1 = scmp.lt.s32.totalorder %s1243_s12, 3 }
   0x4   : > { %p139_p2 = pnand %p957_p0, %p138_p1 }
   0x5   : > { %s958_s16 = sshll.u32 (!%p139_p2), %s953_s13, 5  ;;  %s1245_s23 = smov (!%p139_p2), 96  }
   0x6   : > { %142 = sbr.rel (%p139_p2) target bundleno = 422 (0x1a6), region = 32  ;;  %p163_p3 = scmp.lt.s32.totalorder (!%p139_p2), %s958_s16, 63 }
   0xb   : > { %v1092_v0 = vld [vmem:[%s1591_s1] sm:$0xff]   ;;  %s1595_s16 = smov (!%p163_p3, %s958_s16), 63  ;;  %vm302_vm0 = vcmask 130048   ;;  %vm864_vm1 = vcmask 261120  }
   0xc   : > { %1047 = vmatprep.subr.bf16.mxu0 %v1092_v0  ;;  %1081 = vmatprep.subr.bf16.mxu1 %v1092_v0  ;;  %s959_s17 = sshll.u32 %s1595_s16, 2  ;;  %v1320_v17 = vld [vmem:[%s1592_s2] ss:$0 sm:$0xff]  ;;  %s961_s24 = sshll.u32 %s1595_s16, 3 }
   0xd   : > { %1048 = vmatpush3.bf16.msra.mxu0 %v1092_v0  ;;  %1082 = vmatpush3.bf16.msra.mxu1 %v1092_v0  ;;  %s1283_s20 = scalar_lea.vmem %s1590_s0, %s959_s17  ;;  %s1489_s27 = scalar_lea.vmem %s1593_s3, %s961_s24 }
   0xe   : > { %v1093_v1 = vld [vmem:[%s1283_s20] sm:$0xff]   ;;  %v1095_v3 = vld [vmem:[%s1283_s20 + $0x8] sm:$0xff]   ;;  %v1097_v5 = vld [vmem:[%s1283_s20 + $0x10] sm:$0xff]  }
   0xf   : > { %v1094_v2 = vld [vmem:[%s1283_s20 + $0x40] sm:$0xff]   ;;  %1049 = vmatprep.mubr.msk.bf16.mxu0 %vm302_vm0, %v1093_v1  ;;  %v1096_v4 = vld [vmem:[%s1283_s20 + $0x48] sm:$0xff]   ;;  %v1099_v6 = vld [vmem:[%s1283_s20 + $0x50] sm:$0xff]  }
  0x10   : > { %1065 = vmatprep.mubr.msk.bf16.mxu1 %vm302_vm0, %v1094_v2  ;;  %1050 = vmatmul.mubr.msk.bf16.vlgmr.msra.gmra.mxu0 %vm302_vm0, %v1095_v3  ;;  %v1098_v7 = vld [vmem:[%s1283_s20 + $0x18] sm:$0xff]   ;;  %v1101_v9 = vld [vmem:[%s1283_s20 + $0x20] sm:$0xff]   ;;  %v1102_v11 = vld [vmem:[%s1283_s20 + $0x28] sm:$0xff]  }
  0x11   : > { %1066 = vmatmul.mubr.msk.bf16.vlgmr.msra.gmra.mxu1 %vm302_vm0, %v1096_v4  ;;  %1053 = vmatprep.mubr.msk.bf16.mxu0 %vm302_vm0, %v1097_v5  ;;  %v1100_v8 = vld [vmem:[%s1283_s20 + $0x58] sm:$0xff]   ;;  %v1103_v10 = vld [vmem:[%s1283_s20 + $0x60] sm:$0xff]   ;;  %v1104_v12 = vld [vmem:[%s1283_s20 + $0x68] sm:$0xff]  }
  0x12   : > { %1069 = vmatprep.mubr.msk.bf16.mxu1 %vm302_vm0, %v1099_v6  ;;  %v1105_v13 = vld [vmem:[%s1283_s20 + $0x30] sm:$0xff]   ;;  %v1106_v15 = vld [vmem:[%s1283_s20 + $0x38] sm:$0xff]  }
  0x13   : > { %v1107_v14 = vld [vmem:[%s1283_s20 + $0x70] sm:$0xff]   ;;  %v1108_v16 = vld [vmem:[%s1283_s20 + $0x78] sm:$0xff]  }
  0x18   : > { %1054 = vmatmul.mubr.msk.bf16.gmra.mxu0 %vm302_vm0, %v1098_v7 }
  0x19   : > { %1070 = vmatmul.mubr.msk.bf16.gmra.mxu1 %vm302_vm0, %v1100_v8  ;;  %1057 = vmatprep.mubr.msk.bf16.mxu0 %vm302_vm0, %v1101_v9 }
  0x1a   : > { %1073 = vmatprep.mubr.msk.bf16.mxu1 %vm302_vm0, %v1103_v10 }
  0x20   : > { %1058 = vmatmul.mubr.msk.bf16.gmra.mxu0 %vm302_vm0, %v1102_v11 }
  0x21   : > { %1074 = vmatmul.mubr.msk.bf16.gmra.mxu1 %vm302_vm0, %v1104_v12  ;;  %1061 = vmatprep.mubr.msk.bf16.mxu0 %vm302_vm0, %v1105_v13 }
  0x22   : > { %1077 = vmatprep.mubr.msk.bf16.mxu1 %vm302_vm0, %v1107_v14 }
  0x28   : > { %1062 = vmatmul.mubr.msk.bf16.gmra.mxu0 %vm302_vm0, %v1106_v15 }
  0x29   : > { %1078 = vmatmul.mubr.msk.bf16.gmra.mxu1 %vm302_vm0, %v1108_v16 }
  0xd0   : > { %v1051_v18 = vpop.f32.mrf.mxu0 }
  0xd1   : > { %v1323_v19 = vadd.f32 %v1051_v18, %v1320_v17  ;;  %v1067_v20 = vpop.f32.mrf.mxu1 }
  0xd2   : > { %v1326_v21 = vadd.f32 %v1067_v20, %v1320_v17  ;;  %v385_v22 = vpop.f32.mrf.mxu0 }
  0xd3   : > { %v998_v23 = vmul.f32 -1.442695, %v1323_v19  ;;  %v1330_v24 = vadd.f32 %v1320_v17, %v385_v22  ;;  %v449_v25 = vpop.f32.mrf.mxu1 }
  0xd4   : > { %v1014_v26 = vmul.f32 -1.442695, %v1326_v21  ;;  %v1334_v27 = vadd.f32 %v1320_v17, %v449_v25  ;;  %v1052_v28 = vpop.f32.mrf.mxu0 }
  0xd5   : > { %1109 = vpow2.f32 %v998_v23  ;;  %v996_v29 = vmul.f32 -1.442695, %v1330_v24  ;;  %v1338_v30 = vadd.f32 %v1052_v28, %v1320_v17  ;;  %v1068_v31 = vpop.f32.mrf.mxu1 }
  0xd6   : > { %1111 = vpow2.f32 %v1014_v26  ;;  %v1012_v32 = vmul.f32 -1.442695, %v1334_v27  ;;  %v1342_v33 = vadd.f32 %v1068_v31, %v1320_v17  ;;  %v388_v34 = vpop.f32.mrf.mxu0 }
  0xd7   : > { %1113 = vpow2.f32 %v996_v29  ;;  %v999_v35 = vmul.f32 -1.442695, %v1338_v30  ;;  %v1346_v36 = vadd.f32 %v1320_v17, %v388_v34  ;;  %v452_v37 = vpop.f32.mrf.mxu1 }
  0xd8   : > { %1115 = vpow2.f32 %v1012_v32  ;;  %v1015_v38 = vmul.f32 -1.442695, %v1342_v33  ;;  %v1350_v39 = vadd.f32 %v1320_v17, %v452_v37  ;;  %v1055_v40 = vpop.f32.mrf.mxu0 }
  0xd9   : > { %1117 = vpow2.f32 %v999_v35  ;;  %v997_v41 = vmul.f32 -1.442695, %v1346_v36  ;;  %v1354_v42 = vadd.f32 %v1055_v40, %v1320_v17  ;;  %v1071_v43 = vpop.f32.mrf.mxu1 }
  0xda   : > { %1119 = vpow2.f32 %v1015_v38  ;;  %v1013_v44 = vmul.f32 -1.442695, %v1350_v39  ;;  %v401_v45 = vpop.f32.mrf.mxu0  ;;  %v1358_v46 = vadd.f32 %v1071_v43, %v1320_v17 }
  0xdb   : > { %v1002_v47 = vmul.f32 -1.442695, %v1354_v42  ;;  %v465_v48 = vpop.f32.mrf.mxu1  ;;  %1121 = vpow2.f32 %v997_v41  ;;  %v1369_v55 = vadd.f32 %v1320_v17, %v401_v45 }
  0xdc   : > { %v1018_v49 = vmul.f32 -1.442695, %v1358_v46  ;;  %v1056_v50 = vpop.f32.mrf.mxu0  ;;  %1123 = vpow2.f32 %v1013_v44  ;;  %v1378_v1 = vadd.f32 %v1320_v17, %v465_v48 }
  0xdd   : > { %v1363_v51 = vadd.f32 %v1056_v50, %v1320_v17  ;;  %v1072_v52 = vpop.f32.mrf.mxu1  ;;  %1125 = vpow2.f32 %v1002_v47  ;;  %v1000_v0 = vmul.f32 -1.442695, %v1369_v55 }
  0xde   : > { %v404_v53 = vpop.f32.mrf.mxu0  ;;  %v1366_v54 = vadd.f32 %v1072_v52, %v1320_v17  ;;  %1127 = vpow2.f32 %v1018_v49  ;;  %v1016_v13 = vmul.f32 -1.442695, %v1378_v1 }
  0xdf   : > { %v1003_v56 = vmul.f32 -1.442695, %v1363_v51  ;;  %v1373_v57 = vadd.f32 %v1320_v17, %v404_v53  ;;  %v468_v60 = vpop.f32.mrf.mxu1 }
  0xe0   : > { %v1019_v58 = vmul.f32 -1.442695, %v1366_v54  ;;  %v1059_v59 = vpop.f32.mrf.mxu0  ;;  %v1382_v5 = vadd.f32 %v1320_v17, %v468_v60 }
  0xe1   : > { %1129 = vpow2.f32 %v1003_v56  ;;  %v1001_v4 = vmul.f32 -1.442695, %v1373_v57  ;;  %v1075_v7 = vpop.f32.mrf.mxu1  ;;  %v1387_v34 = vadd.f32 %v1059_v59, %v1320_v17 }
  0xe2   : > { %v1110_v61 = vpop.eup %1109  ;;  %1131 = vpow2.f32 %v1019_v58  ;;  %v417_v6 = vpop.f32.mrf.mxu0  ;;  %v1017_v14 = vmul.f32 -1.442695, %v1382_v5  ;;  %v1393_v45 = vadd.f32 %v1075_v7, %v1320_v17 }
  0xe3   : > { %v1112_v62 = vpop.eup %1111  ;;  %v610_v63 = vadd.f32 1.0, %v1110_v61  ;;  %v481_v16 = vpop.f32.mrf.mxu1  ;;  %v1006_v48 = vmul.f32 -1.442695, %v1387_v34  ;;  %v1397_v49 = vadd.f32 %v1320_v17, %v417_v6 }
  0xe4   : > { %v1114_v2 = vpop.eup %1113  ;;  %v626_v3 = vadd.f32 1.0, %v1112_v62  ;;  %v1060_v15 = vpop.f32.mrf.mxu0  ;;  %v1414_v6 = vadd.f32 %v1320_v17, %v481_v16 }
  0xe5   : > { %v1116_v8 = vpop.eup %1115  ;;  %1133 = vrcp.f32 %v610_v63  ;;  %v608_v10 = vadd.f32 1.0, %v1114_v2  ;;  %v1076_v31 = vpop.f32.mrf.mxu1  ;;  %v1390_v43 = vadd.f32 %v1060_v15, %v1320_v17  ;;  %v1022_v63 = vmul.f32 -1.442695, %v1393_v45 }
  0xe6   : > { %v1118_v9 = vpop.eup %1117  ;;  %1135 = vrcp.f32 %v626_v3  ;;  %v624_v23 = vadd.f32 1.0, %v1116_v8  ;;  %v420_v29 = vpop.f32.mrf.mxu0  ;;  %v1406_v61 = vadd.f32 %v1076_v31, %v1320_v17  ;;  %v1004_v2 = vmul.f32 -1.442695, %v1397_v49 }
  0xe7   : > { %v1120_v11 = vpop.eup %1119  ;;  %v611_v12 = vadd.f32 1.0, %v1118_v9  ;;  %1137 = vpow2.f32 %v1000_v0  ;;  %v484_v47 = vpop.f32.mrf.mxu1  ;;  %v1400_v53 = vadd.f32 %v1320_v17, %v420_v29  ;;  %v1007_v60 = vmul.f32 -1.442695, %v1390_v43 }
  0xe8   : > { %1139 = vpow2.f32 %v1001_v4  ;;  %v1122_v18 = vpop.eup %1121  ;;  %v627_v20 = vadd.f32 1.0, %v1120_v11  ;;  %v1063_v38 = vpop.f32.mrf.mxu0  ;;  %v1418_v11 = vadd.f32 %v1320_v17, %v484_v47 }
  0xe9   : > { %1141 = vrcp.f32 %v611_v12  ;;  %v1124_v22 = vpop.eup %1123  ;;  %v609_v28 = vadd.f32 1.0, %v1122_v18  ;;  %v1402_v58 = vpop.f32.mrf.mxu1  ;;  %v1005_v4 = vmul.f32 -1.442695, %v1400_v53  ;;  %v1020_v18 = vmul.f32 -1.442695, %v1414_v6 }
  0xea   : > { %1143 = vrcp.f32 %v608_v10  ;;  %v1126_v25 = vpop.eup %1125  ;;  %v625_v32 = vadd.f32 1.0, %v1124_v22  ;;  %v433_v56 = vpop.f32.mrf.mxu0  ;;  %v1023_v10 = vmul.f32 -1.442695, %v1406_v61 }
  0xeb   : > { %1145 = vpow2.f32 %v1016_v13  ;;  %v1128_v26 = vpop.eup %1127  ;;  %v614_v37 = vadd.f32 1.0, %v1126_v25  ;;  %v497_v8 = vpop.f32.mrf.mxu1  ;;  %v1432_v31 = vadd.f32 %v1320_v17, %v433_v56 }
  0xec   : > { %1147 = vpow2.f32 %v1017_v14  ;;  %v630_v41 = vadd.f32 1.0, %v1128_v26  ;;  %v1064_v7 = vpop.f32.mrf.mxu0  ;;  %v1021_v26 = vmul.f32 -1.442695, %v1418_v11 }
  0xed   : > { %1149 = vrcp.f32 %v627_v20  ;;  %v1424_v20 = vadd.f32 %v1063_v38, %v1320_v17 }
  0xee   : > { %v1130_v35 = vpop.eup %1129  ;;  %1151 = vrcp.f32 %v624_v23  ;;  %v436_v22 = vpop.f32.mrf.mxu0 }
  0xef   : > { %v1132_v40 = vpop.eup %1131  ;;  %1153 = vrcp.f32 %v609_v28  ;;  %v615_v44 = vadd.f32 1.0, %v1130_v35  ;;  %v1080_v23 = vpop.f32.mrf.mxu1  ;;  %v1428_v28 = vadd.f32 %v1064_v7, %v1320_v17 }
  0xf0   : > { %1155 = vrcp.f32 %v625_v32  ;;  %v631_v52 = vadd.f32 1.0, %v1132_v40  ;;  %v1010_v40 = vmul.f32 -1.442695, %v1424_v20 }
  0xf1   : > { %1157 = vrcp.f32 %v614_v37  ;;  %v1436_v37 = vadd.f32 %v1320_v17, %v436_v22  ;;  %v1011_v47 = vmul.f32 -1.442695, %v1428_v28 }
  0xf2   : > { %v1134_v50 = vpop.eup %1133  ;;  %1159 = vrcp.f32 %v630_v41  ;;  %v500_v41 = vpop.f32.mrf.mxu1 }
  0xf3   : > { %v1136_v59 = vpop.eup %1135  ;;  %740 = vrot.lane.b32.xlu1 %v1134_v50, %s1245_s23  ;;  %1161 = vrcp.f32 %v615_v44  ;;  %v1008_v50 = vmul.f32 -1.442695, %v1432_v31 }
  0xf4   : > { %v1138_v62 = vpop.eup %1137  ;;  %772 = vrot.lane.b32.xlu0 %v1136_v59, %s1245_s23  ;;  %1163 = vpow2.f32 %v1006_v48  ;;  %v1009_v59 = vmul.f32 -1.442695, %v1436_v37 }
  0xf5   : > { %v1140_v0 = vpop.eup %1139  ;;  %1165 = vrcp.f32 %v631_v52  ;;  %v612_v13 = vadd.f32 1.0, %v1138_v62  ;;  %v1443_v52 = vadd.f32 %v1320_v17, %v497_v8 }
  0xf6   : > { %v1142_v3 = vpop.eup %1141  ;;  %1167 = vpow2.f32 %v1007_v60  ;;  %v613_v15 = vadd.f32 1.0, %v1140_v0  ;;  %v1448_v60 = vadd.f32 %v1320_v17, %v500_v41 }
  0xf7   : > { %v1144_v9 = vpop.eup %1143  ;;  %742 = vrot.lane.b32.xlu1 %v1142_v3, %s1245_s23  ;;  %1169 = vpow2.f32 %v1022_v63  ;;  %v1453_v3 = vadd.f32 %v1402_v58, %v1320_v17 }
  0xf8   : > { %v1146_v12 = vpop.eup %1145  ;;  %736 = vrot.lane.b32.xlu0 %v1144_v9, %s1245_s23  ;;  %1171 = vpow2.f32 %v1004_v2  ;;  %v1458_v9 = vadd.f32 %v1080_v23, %v1320_v17 }
  0xf9   : > { %v1148_v14 = vpop.eup %1147  ;;  %1173 = vpow2.f32 %v1005_v4  ;;  %v628_v29 = vadd.f32 1.0, %v1146_v12  ;;  %v1024_v4 = vmul.f32 -1.442695, %v1443_v52 }
  0xfa   : > { %v1150_v16 = vpop.eup %1149  ;;  %1175 = vpow2.f32 %v1023_v10  ;;  %v629_v35 = vadd.f32 1.0, %v1148_v14  ;;  %v1025_v10 = vmul.f32 -1.442695, %v1448_v60  ;;  %v1027_v17 = vmul.f32 -1.442695, %v1458_v9 }
  0xfb   : > { %v1152_v25 = vpop.eup %1151  ;;  %774 = vrot.lane.b32.xlu1 %v1150_v16, %s1245_s23  ;;  %1177 = vrcp.f32 %v612_v13 }
  0xfc   : > { %768 = vrot.lane.b32.xlu0 %v1152_v25, %s1245_s23  ;;  %v1154_v32 = vpop.eup %1153  ;;  %1179 = vrcp.f32 %v613_v15  ;;  %v1026_v15 = vmul.f32 -1.442695, %v1453_v3 }
  0xfd   : > { %v1156_v38 = vpop.eup %1155  ;;  %1181 = vpow2.f32 %v1020_v18 }
  0xfe   : > { %v1158_v44 = vpop.eup %1157  ;;  %1183 = vpow2.f32 %v1021_v26 }
  0xff   : > { %770 = vrot.lane.b32.xlu1 %v1156_v38, %s1245_s23  ;;  %v1160_v48 = vpop.eup %1159  ;;  %1185 = vrcp.f32 %v628_v29 }
 0x100   : > { %738 = vrot.lane.b32.xlu0 %v1154_v32, %s1245_s23  ;;  %v1162_v56 = vpop.eup %1161  ;;  %1187 = vrcp.f32 %v629_v35 }
 0x101   : > { %v1164_v62 = vpop.eup %1163  ;;  %1189 = vpow2.f32 %v1010_v40 }
 0x102   : > { %v1166_v63 = vpop.eup %1165  ;;  %v618_v0 = vadd.f32 1.0, %v1164_v62  ;;  %1191 = vpow2.f32 %v1011_v47 }
 0x103   : > { %750 = vrot.lane.b32.xlu1 %v1162_v56, %s1245_s23  ;;  %v1168_v2 = vpop.eup %1167  ;;  %1193 = vpow2.f32 %v1008_v50 }
 0x104   : > { %748 = vrot.lane.b32.xlu0 %v1158_v44, %s1245_s23  ;;  %v1170_v7 = vpop.eup %1169  ;;  %v619_v8 = vadd.f32 1.0, %v1168_v2  ;;  %1195 = vpow2.f32 %v1009_v59 }
 0x105   : > { %v1172_v12 = vpop.eup %1171  ;;  %1197 = vrcp.f32 %v618_v0  ;;  %v634_v13 = vadd.f32 1.0, %v1170_v7 }
 0x106   : > { %v1174_v14 = vpop.eup %1173  ;;  %1199 = vrcp.f32 %v619_v8  ;;  %v616_v23 = vadd.f32 1.0, %v1172_v12 }
 0x107   : > { %782 = vrot.lane.b32.xlu1 %v1166_v63, %s1245_s23  ;;  %v1176_v58 = vpop.eup %1175  ;;  %1201 = vpow2.f32 %v1024_v4  ;;  %v617_v26 = vadd.f32 1.0, %v1174_v14 }
 0x108   : > { %780 = vrot.lane.b32.xlu0 %v1160_v48, %s1245_s23  ;;  %v1178_v16 = vpop.eup %1177  ;;  %v635_v18 = vadd.f32 1.0, %v1176_v58  ;;  %1203 = vpow2.f32 %v1025_v10 }
 0x109   : > { %v1180_v22 = vpop.eup %1179  ;;  %1205 = vrcp.f32 %v634_v13 }
 0x10a   : > { %v1182_v25 = vpop.eup %1181  ;;  %1207 = vrcp.f32 %v635_v18 }
 0x10b   : > { %746 = vrot.lane.b32.xlu1 %v1180_v22, %s1245_s23  ;;  %v1184_v29 = vpop.eup %1183  ;;  %1209 = vpow2.f32 %v1026_v15  ;;  %v632_v38 = vadd.f32 1.0, %v1182_v25 }
 0x10c   : > { %744 = vrot.lane.b32.xlu0 %v1178_v16, %s1245_s23  ;;  %v1186_v32 = vpop.eup %1185  ;;  %1211 = vpow2.f32 %v1027_v17  ;;  %v633_v41 = vadd.f32 1.0, %v1184_v29 }
 0x10d   : > { %v1188_v35 = vpop.eup %1187  ;;  %1213 = vrcp.f32 %v616_v23 }
 0x10e   : > { %v1190_v40 = vpop.eup %1189  ;;  %1215 = vrcp.f32 %v617_v26 }
 0x10f   : > { %778 = vrot.lane.b32.xlu1 %v1188_v35, %s1245_s23  ;;  %v1192_v44 = vpop.eup %1191  ;;  %1217 = vrcp.f32 %v632_v38  ;;  %v622_v50 = vadd.f32 1.0, %v1190_v40 }
 0x110   : > { %776 = vrot.lane.b32.xlu0 %v1186_v32, %s1245_s23  ;;  %v1194_v47 = vpop.eup %1193  ;;  %1219 = vrcp.f32 %v633_v41  ;;  %v623_v59 = vadd.f32 1.0, %v1192_v44 }
 0x111   : > { %v1196_v48 = vpop.eup %1195  ;;  %1221 = vrcp.f32 %v622_v50  ;;  %v620_v2 = vadd.f32 1.0, %v1194_v47 }
 0x112   : > { %v1198_v56 = vpop.eup %1197  ;;  %1223 = vrcp.f32 %v623_v59  ;;  %v621_v7 = vadd.f32 1.0, %v1196_v48 }
 0x113   : > { %v1200_v62 = vpop.eup %1199  ;;  %1225 = vrcp.f32 %v620_v2 }
 0x114   : > { %756 = vrot.lane.b32.xlu0 %v1198_v56, %s1245_s23  ;;  %v1202_v63 = vpop.eup %1201  ;;  %758 = vrot.lane.b32.xlu1 %v1200_v62, %s1245_s23  ;;  %1227 = vrcp.f32 %v621_v7 }
 0x115   : > { %v1204_v0 = vpop.eup %1203  ;;  %v636_v13 = vadd.f32 1.0, %v1202_v63 }
 0x116   : > { %v1206_v4 = vpop.eup %1205  ;;  %v637_v58 = vadd.f32 1.0, %v1204_v0 }
 0x117   : > { %v1208_v8 = vpop.eup %1207  ;;  %1229 = vrcp.f32 %v636_v13 }
 0x118   : > { %788 = vrot.lane.b32.xlu0 %v1206_v4, %s1245_s23  ;;  %v1210_v10 = vpop.eup %1209  ;;  %790 = vrot.lane.b32.xlu1 %v1208_v8, %s1245_s23  ;;  %1231 = vrcp.f32 %v637_v58 }
 0x119   : > { %v1212_v12 = vpop.eup %1211  ;;  %v638_v16 = vadd.f32 1.0, %v1210_v10 }
 0x11a   : > { %v1214_v14 = vpop.eup %1213  ;;  %v639_v17 = vadd.f32 1.0, %v1212_v12 }
 0x11b   : > { %v1216_v15 = vpop.eup %1215  ;;  %1233 = vrcp.f32 %v638_v16 }
 0x11c   : > { %752 = vrot.lane.b32.xlu0 %v1214_v14, %s1245_s23  ;;  %754 = vrot.lane.b32.xlu1 %v1216_v15, %s1245_s23  ;;  %v1218_v18 = vpop.eup %1217  ;;  %1235 = vrcp.f32 %v639_v17 }
 0x11d   : > { %v1220_v22 = vpop.eup %1219 }
 0x11e   : > { %v1222_v23 = vpop.eup %1221 }
 0x11f   : > { %v1224_v25 = vpop.eup %1223 }
 0x120   : > { %784 = vrot.lane.b32.xlu0 %v1218_v18, %s1245_s23  ;;  %786 = vrot.lane.b32.xlu1 %v1220_v22, %s1245_s23  ;;  %v1226_v26 = vpop.eup %1225 }
 0x121   : > { %v1228_v29 = vpop.eup %1227 }
 0x124   : > { %764 = vrot.lane.b32.xlu0 %v1222_v23, %s1245_s23  ;;  %766 = vrot.lane.b32.xlu1 %v1224_v25, %s1245_s23  ;;  %v1230_v32 = vpop.eup %1229 }
 0x125   : > { %v1232_v35 = vpop.eup %1231 }
 0x128   : > { %760 = vrot.lane.b32.xlu0 %v1226_v26, %s1245_s23  ;;  %762 = vrot.lane.b32.xlu1 %v1228_v29, %s1245_s23  ;;  %v1234_v38 = vpop.eup %1233 }
 0x129   : > { %v1236_v40 = vpop.eup %1235 }
 0x12c   : > { %792 = vrot.lane.b32.xlu0 %v1230_v32, %s1245_s23  ;;  %794 = vrot.lane.b32.xlu1 %v1232_v35, %s1245_s23 }
 0x130   : > { %796 = vrot.lane.b32.xlu0 %v1234_v38, %s1245_s23  ;;  %798 = vrot.lane.b32.xlu1 %v1236_v40, %s1245_s23 }
 0x165   : > { %v741_v41 = vpop.permute.xlu1 %740 }
 0x166   : > { %v773_v44 = vpop.permute.xlu0 %772  ;;  %v834_v47 = vmul.f32 %v741_v41, %v1323_v19 }
 0x167   : > { %v850_v48 = vmul.f32 %v773_v44, %v1326_v21 }
 0x168   : > { %867 = vst.msk [vmem:[%s1489_s27 + $0x10] sm:$0xff] %vm864_vm1, %v834_v47 }
 0x169   : > { %883 = vst.msk [vmem:[%s1489_s27 + $0x90] sm:$0xff] %vm864_vm1, %v850_v48  ;;  %v743_v50 = vpop.permute.xlu1 %742 }
 0x16a   : > { %v835_v56 = vmul.f32 %v743_v50, %v1338_v30  ;;  %v737_v59 = vpop.permute.xlu0 %736 }
 0x16b   : > { %v832_v62 = vmul.f32 %v737_v59, %v1330_v24 }
 0x16c   : > { %868 = vst.msk [vmem:[%s1489_s27 + $0x18] sm:$0xff] %vm864_vm1, %v835_v56 }
 0x16d   : > { %865 = vst.msk [vmem:[%s1489_s27] sm:$0xff] %vm864_vm1, %v832_v62  ;;  %v775_v63 = vpop.permute.xlu1 %774 }
 0x16e   : > { %v851_v19 = vmul.f32 %v775_v63, %v1342_v33  ;;  %v769_v21 = vpop.permute.xlu0 %768 }
 0x16f   : > { %v848_v0 = vmul.f32 %v769_v21, %v1334_v27 }
 0x170   : > { %884 = vst.msk [vmem:[%s1489_s27 + $0x98] sm:$0xff] %vm864_vm1, %v851_v19 }
 0x171   : > { %881 = vst.msk [vmem:[%s1489_s27 + $0x80] sm:$0xff] %vm864_vm1, %v848_v0  ;;  %v771_v30 = vpop.permute.xlu1 %770 }
 0x172   : > { %v849_v24 = vmul.f32 %v771_v30, %v1350_v39  ;;  %v739_v2 = vpop.permute.xlu0 %738 }
 0x173   : > { %v833_v4 = vmul.f32 %v739_v2, %v1346_v36 }
 0x174   : > { %882 = vst.msk [vmem:[%s1489_s27 + $0x88] sm:$0xff] %vm864_vm1, %v849_v24 }
 0x175   : > { %866 = vst.msk [vmem:[%s1489_s27 + $0x8] sm:$0xff] %vm864_vm1, %v833_v4  ;;  %v751_v33 = vpop.permute.xlu1 %750 }
 0x176   : > { %v839_v27 = vmul.f32 %v751_v33, %v1363_v51  ;;  %v749_v7 = vpop.permute.xlu0 %748 }
 0x177   : > { %v838_v8 = vmul.f32 %v749_v7, %v1354_v42 }
 0x178   : > { %872 = vst.msk [vmem:[%s1489_s27 + $0x38] sm:$0xff] %vm864_vm1, %v839_v27 }
 0x179   : > { %871 = vst.msk [vmem:[%s1489_s27 + $0x30] sm:$0xff] %vm864_vm1, %v838_v8  ;;  %v783_v39 = vpop.permute.xlu1 %782 }
 0x17a   : > { %v855_v36 = vmul.f32 %v783_v39, %v1366_v54  ;;  %v781_v10 = vpop.permute.xlu0 %780 }
 0x17b   : > { %v854_v12 = vmul.f32 %v781_v10, %v1358_v46 }
 0x17c   : > { %888 = vst.msk [vmem:[%s1489_s27 + $0xb8] sm:$0xff] %vm864_vm1, %v855_v36 }
 0x17d   : > { %887 = vst.msk [vmem:[%s1489_s27 + $0xb0] sm:$0xff] %vm864_vm1, %v854_v12  ;;  %v747_v51 = vpop.permute.xlu1 %746 }
 0x17e   : > { %v837_v42 = vmul.f32 %v747_v51, %v1373_v57  ;;  %v745_v13 = vpop.permute.xlu0 %744 }
 0x17f   : > { %v836_v14 = vmul.f32 %v745_v13, %v1369_v55 }
 0x180   : > { %870 = vst.msk [vmem:[%s1489_s27 + $0x28] sm:$0xff] %vm864_vm1, %v837_v42 }
 0x181   : > { %869 = vst.msk [vmem:[%s1489_s27 + $0x20] sm:$0xff] %vm864_vm1, %v836_v14  ;;  %v779_v54 = vpop.permute.xlu1 %778 }
 0x182   : > { %v853_v46 = vmul.f32 %v779_v54, %v1382_v5  ;;  %v777_v58 = vpop.permute.xlu0 %776 }
 0x183   : > { %v852_v15 = vmul.f32 %v777_v58, %v1378_v1 }
 0x184   : > { %886 = vst.msk [vmem:[%s1489_s27 + $0xa8] sm:$0xff] %vm864_vm1, %v853_v46 }
 0x185   : > { %885 = vst.msk [vmem:[%s1489_s27 + $0xa0] sm:$0xff] %vm864_vm1, %v852_v15 }
 0x186   : > { %v757_v57 = vpop.permute.xlu0 %756  ;;  %v759_v16 = vpop.permute.xlu1 %758 }
 0x187   : > { %v842_v55 = vmul.f32 %v757_v57, %v1387_v34  ;;  %v843_v18 = vmul.f32 %v759_v16, %v1390_v43 }
 0x189   : > { %875 = vst.msk [vmem:[%s1489_s27 + $0x50] sm:$0xff] %vm864_vm1, %v842_v55  ;;  %876 = vst.msk [vmem:[%s1489_s27 + $0x58] sm:$0xff] %vm864_vm1, %v843_v18 }
 0x18a   : > { %v789_v5 = vpop.permute.xlu0 %788  ;;  %v791_v17 = vpop.permute.xlu1 %790 }
 0x18b   : > { %v858_v1 = vmul.f32 %v789_v5, %v1393_v45  ;;  %v859_v22 = vmul.f32 %v791_v17, %v1406_v61 }
 0x18d   : > { %891 = vst.msk [vmem:[%s1489_s27 + $0xd0] sm:$0xff] %vm864_vm1, %v858_v1  ;;  %892 = vst.msk [vmem:[%s1489_s27 + $0xd8] sm:$0xff] %vm864_vm1, %v859_v22 }
 0x18e   : > { %v753_v23 = vpop.permute.xlu0 %752  ;;  %v755_v34 = vpop.permute.xlu1 %754 }
 0x18f   : > { %v840_v43 = vmul.f32 %v753_v23, %v1397_v49  ;;  %v841_v25 = vmul.f32 %v755_v34, %v1400_v53 }
 0x191   : > { %873 = vst.msk [vmem:[%s1489_s27 + $0x40] sm:$0xff] %vm864_vm1, %v840_v43  ;;  %874 = vst.msk [vmem:[%s1489_s27 + $0x48] sm:$0xff] %vm864_vm1, %v841_v25 }
 0x192   : > { %v785_v26 = vpop.permute.xlu0 %784  ;;  %v787_v45 = vpop.permute.xlu1 %786 }
 0x193   : > { %v856_v61 = vmul.f32 %v785_v26, %v1414_v6  ;;  %v857_v29 = vmul.f32 %v787_v45, %v1418_v11 }
 0x195   : > { %889 = vst.msk [vmem:[%s1489_s27 + $0xc0] sm:$0xff] %vm864_vm1, %v856_v61  ;;  %890 = vst.msk [vmem:[%s1489_s27 + $0xc8] sm:$0xff] %vm864_vm1, %v857_v29 }
 0x196   : > { %v765_v32 = vpop.permute.xlu0 %764  ;;  %v767_v49 = vpop.permute.xlu1 %766 }
 0x197   : > { %v846_v53 = vmul.f32 %v765_v32, %v1424_v20  ;;  %v847_v35 = vmul.f32 %v767_v49, %v1428_v28 }
 0x199   : > { %879 = vst.msk [vmem:[%s1489_s27 + $0x70] sm:$0xff] %vm864_vm1, %v846_v53  ;;  %880 = vst.msk [vmem:[%s1489_s27 + $0x78] sm:$0xff] %vm864_vm1, %v847_v35 }
 0x19a   : > { %v761_v38 = vpop.permute.xlu0 %760  ;;  %v763_v6 = vpop.permute.xlu1 %762 }
 0x19b   : > { %v844_v11 = vmul.f32 %v761_v38, %v1432_v31  ;;  %v845_v40 = vmul.f32 %v763_v6, %v1436_v37 }
 0x19d   : > { %877 = vst.msk [vmem:[%s1489_s27 + $0x60] sm:$0xff] %vm864_vm1, %v844_v11  ;;  %878 = vst.msk [vmem:[%s1489_s27 + $0x68] sm:$0xff] %vm864_vm1, %v845_v40 }
 0x19e   : > { %v793_v41 = vpop.permute.xlu0 %792  ;;  %v795_v20 = vpop.permute.xlu1 %794 }
 0x19f   : > { %v860_v28 = vmul.f32 %v793_v41, %v1443_v52  ;;  %v861_v44 = vmul.f32 %v795_v20, %v1448_v60 }
 0x1a1   : > { %893 = vst.msk [vmem:[%s1489_s27 + $0xe0] sm:$0xff] %vm864_vm1, %v860_v28  ;;  %894 = vst.msk [vmem:[%s1489_s27 + $0xe8] sm:$0xff] %vm864_vm1, %v861_v44 }
 0x1a2   : > { %v797_v47 = vpop.permute.xlu0 %796  ;;  %v799_v48 = vpop.permute.xlu1 %798 }
 0x1a3   : > { %v862_v31 = vmul.f32 %v797_v47, %v1453_v3  ;;  %v863_v37 = vmul.f32 %v799_v48, %v1458_v9 }
 0x1a5   : > { %895 = vst.msk [vmem:[%s1489_s27 + $0xf0] sm:$0xff] %vm864_vm1, %v862_v31  ;;  %896 = vst.msk [vmem:[%s1489_s27 + $0xf8] sm:$0xff] %vm864_vm1, %v863_v37 }
 0x1a6 PF: > { %s13_s12 = sadd.s32 1, %s1243_s12  }
 0x1a7   : > { %p10_p4 = scmp.ge.s32.totalorder %s13_s12, 4  }
 0x1a9   :  { %12 = sbr.rel (!%p10_p4) target bundleno = 1 (0x1), region = 62 }

</bundles_post_ra>
